<compile_context>
chip_gen: v6e
topology: v6e:2x2x1
jax: 0.10.0
libtpu: 0.0.40
codegen_flags: <defaults>
</compile_context>

<pallas_src>
import jax
import jax.numpy as jnp
from jax.experimental import pallas as pl
from jax.experimental.pallas import tpu as pltpu


def _round_up(n, m):
    return ((n + m - 1) // m) * m


def _vmem_budget_bytes():
    """Per-device VMEM budget: generous on 128 MiB chips, conservative otherwise."""
    try:
        kind = jax.devices()[0].device_kind.lower()
    except Exception:
        kind = ""
    big_vmem = any(t in kind for t in ("v4", "v5", "v6"))
    return (100 if big_vmem else 48) * 1024 * 1024, big_vmem


def _vmem_estimate(block_rows, block_f, d_pad):
    """Double-buffered inputs/outputs + f32 accumulator scratch, in bytes."""
    in_bytes = 2 * (block_rows * d_pad * 2      # x tile (bf16)
                    + d_pad * block_f * 2       # W1 F-slice (bf16)
                    + block_f * 4               # b1 F-slice (f32)
                    + block_f * d_pad * 2       # W2 F-slice (bf16)
                    + d_pad * 4)                # b2 (f32)
    out_bytes = 2 * block_rows * d_pad * 2      # output tile (bf16)
    acc_bytes = block_rows * d_pad * 4          # f32 accumulator scratch
    return in_bytes + out_bytes + acc_bytes


def _pick_block_f(f_pad, target):
    """Largest multiple of 128 that divides f_pad and is <= target."""
    if f_pad <= target:
        return f_pad
    c = (min(target, f_pad) // 128) * 128
    while c >= 128:
        if f_pad % c == 0:
            return c
        c -= 128
    return 128


def _maybe_pad2d(a, shape, dtype):
    """Zero-pad only when needed; otherwise just convert dtype."""
    a = a.astype(dtype)
    if a.shape == shape:
        return a
    return jnp.zeros(shape, dtype).at[:a.shape[0], :a.shape[1]].set(a)


def ffn_kernel(x_ref, w1_ref, b1_ref, w2_ref, b2_ref, o_ref, acc_ref):
    # x_ref:  (block_rows, D_pad) bf16
    # w1_ref: (D_pad, block_f) bf16,  b1_ref: (1, block_f) f32
    # w2_ref: (block_f, D_pad) bf16,  b2_ref: (1, D_pad) f32
    # acc_ref: (block_rows, D_pad) f32 scratch, persists across the F axis.
    f = pl.program_id(1)

    # linear_1 partial for this F-chunk (bf16 MXU, f32 accumulation) + bias.
    h = jnp.dot(x_ref[...], w1_ref[...], preferred_element_type=jnp.float32)
    h = h + b1_ref[...]

    # Exact (erf-based) GELU, matching nn.GELU() default.
    inv_sqrt2 = jnp.float32(0.7071067811865476)
    h = 0.5 * h * (1.0 + jax.lax.erf(h * inv_sqrt2))

    # linear_2 partial for this F-chunk.
    partial = jnp.dot(h.astype(w2_ref.dtype), w2_ref[...],
                      preferred_element_type=jnp.float32)

    @pl.when(f == 0)
    def _():
        acc_ref[...] = partial          # first chunk: direct write (no zero-fill)

    @pl.when(f > 0)
    def _():
        acc_ref[...] += partial

    @pl.when(f == pl.num_programs(1) - 1)
    def _():
        # b2 added exactly once; dropout is identity in eval mode.
        o_ref[...] = (acc_ref[...] + b2_ref[...]).astype(o_ref.dtype)


def feed_forward(x2d, w1, b1, w2, b2, *,
                 block_rows=None, block_f=512,
                 compute_dtype=jnp.bfloat16, out_dtype=jnp.bfloat16):
    """x2d: (N, model_dim). Weights stored as [in, out]. Returns (N, model_dim) out_dtype."""
    N, D = x2d.shape
    Din, F = w1.shape
    assert Din == D and w2.shape == (F, D)
    assert b1.size == F and b2.size == D

    vmem_budget, big_vmem = _vmem_budget_bytes()
    if block_rows is None:
        block_rows = 1024 if big_vmem else 512

    # Lane-dense padding of the feature axes; block_f divides F_pad exactly.
    D_pad = _round_up(D, 128)
    F_pad = _round_up(F, 128)
    block_f = _pick_block_f(F_pad, block_f)

    # Row tiling: multiple of 8, no larger than the (padded) row count; give
    # both TensorCores work when there are enough rows.
    rows8 = _round_up(N, 8)
    block_rows = min(block_rows, rows8)
    if rows8 >= 512 and rows8 <= block_rows:
        block_rows = _round_up(rows8 // 2, 8)

    # Shrink tiles until the double-buffered working set fits the VMEM budget.
    while _vmem_estimate(block_rows, block_f, D_pad) > vmem_budget and block_rows > 128:
        block_rows = max(128, block_rows - 128)
    while _vmem_estimate(block_rows, block_f, D_pad) > vmem_budget and block_f > 128:
        block_f = _pick_block_f(F_pad, max(128, block_f // 2))

    N_pad = _round_up(N, block_rows)

    # Pad/convert operands (no-op copies skipped when shapes already match).
    xb = _maybe_pad2d(x2d, (N_pad, D_pad), compute_dtype)
    w1b = _maybe_pad2d(w1, (D_pad, F_pad), compute_dtype)
    w2b = _maybe_pad2d(w2, (F_pad, D_pad), compute_dtype)
    b1p = _maybe_pad2d(b1.reshape(1, F), (1, F_pad), jnp.float32)
    b2p = _maybe_pad2d(b2.reshape(1, D), (1, D_pad), jnp.float32)

    grid = (N_pad // block_rows, F_pad // block_f)

    out = pl.pallas_call(
        ffn_kernel,
        out_shape=jax.ShapeDtypeStruct((N_pad, D_pad), out_dtype),
        grid_spec=pltpu.PrefetchScalarGridSpec(
            num_scalar_prefetch=0,
            grid=grid,
            in_specs=[
                pl.BlockSpec((block_rows, D_pad), lambda i, f: (i, 0)),  # x row tile
                pl.BlockSpec((D_pad, block_f), lambda i, f: (0, f)),     # W1 F-slice
                pl.BlockSpec((1, block_f), lambda i, f: (0, f)),         # b1 F-slice
                pl.BlockSpec((block_f, D_pad), lambda i, f: (f, 0)),     # W2 F-slice
                pl.BlockSpec((1, D_pad), lambda i, f: (0, 0)),           # b2
            ],
            out_specs=pl.BlockSpec((block_rows, D_pad), lambda i, f: (i, 0)),
            scratch_shapes=[pltpu.VMEM((block_rows, D_pad), jnp.float32)],
        ),
        compiler_params=pltpu.CompilerParams(
            dimension_semantics=("parallel", "arbitrary"),
            vmem_limit_bytes=vmem_budget,
        ),
    )(xb, w1b, b1p, w2b, b2p)

    return out[:N, :D]


def feed_forward_ref(x2d, w1, b1, w2, b2, compute_dtype=jnp.bfloat16):
    """Pure-JAX reference matching the kernel's bf16-input / f32-accumulate path."""
    h = jnp.dot(x2d.astype(compute_dtype), w1.astype(compute_dtype),
                preferred_element_type=jnp.float32) + b1.reshape(1, -1)
    h = jax.nn.gelu(h, approximate=False)
    return jnp.dot(h.astype(compute_dtype), w2.astype(compute_dtype),
                   preferred_element_type=jnp.float32) + b2.reshape(1, -1)


if __name__ == "__main__":
    # Small, deterministic problem: batch=2, seq=8, model_dim=32, ff_dim=64.
    batch, seq, model_dim, ff_dim = 2, 8, 32, 64

    key = jax.random.PRNGKey(0)
    kx, k1, kb1, k2, kb2 = jax.random.split(key, 5)

    x = jax.random.normal(kx, (batch, seq, model_dim), dtype=jnp.float32)

    # Deterministic parameter init (Linear: weights stored as [in, out]).
    w1 = jax.random.normal(k1, (model_dim, ff_dim), dtype=jnp.float32) / jnp.sqrt(model_dim)
    b1 = jax.random.normal(kb1, (1, ff_dim), dtype=jnp.float32) * 0.01
    w2 = jax.random.normal(k2, (ff_dim, model_dim), dtype=jnp.float32) / jnp.sqrt(ff_dim)
    b2 = jax.random.normal(kb2, (1, model_dim), dtype=jnp.float32) * 0.01

    x2d = x.reshape(batch * seq, model_dim)

    out2d = feed_forward(x2d, w1, b1, w2, b2)
    out = out2d.reshape(batch, seq, model_dim)
    jax.block_until_ready(out)

    # Correctness check against a pure-JAX reference using the same bf16
    # compute / f32 accumulate numerics (output is bf16, hence the tolerance).
    ref = feed_forward_ref(x2d, w1, b1, w2, b2).reshape(batch, seq, model_dim)
    assert jnp.allclose(out.astype(jnp.float32), ref, atol=2e-2, rtol=2e-2), \
        "mismatch vs reference"

    print("KERNEL_OK")
</pallas_src>

<mosaic_0001>
module attributes {stable_mosaic.version = 11 : i64} {
  func.func @ffn_kernel(%arg0: i32, %arg1: i32, %arg2: memref<16x128xbf16, #tpu.memory_space<vmem>>, %arg3: memref<128x128xbf16, #tpu.memory_space<vmem>>, %arg4: memref<1x128xf32, #tpu.memory_space<vmem>>, %arg5: memref<128x128xbf16, #tpu.memory_space<vmem>>, %arg6: memref<1x128xf32, #tpu.memory_space<vmem>>, %arg7: memref<16x128xbf16, #tpu.memory_space<vmem>>, %arg8: memref<16x128xf32, #tpu.memory_space<vmem>>) attributes {dimension_semantics = [#tpu.dimension_semantics<parallel>, #tpu.dimension_semantics<arbitrary>], iteration_bounds = array<i64: 1, 1>, scalar_prefetch = 0 : i64, scratch_operands = 1 : i64, tpu.core_type = #tpu.core_type<tc>, window_params = [{transform_indices = @transform_0, window_bounds = array<i64: 16, 128>}, {transform_indices = @transform_1, window_bounds = array<i64: 128, 128>}, {transform_indices = @transform_2, window_bounds = array<i64: 1, 128>}, {transform_indices = @transform_3, window_bounds = array<i64: 128, 128>}, {pipeline_mode = #tpu.pipeline_mode<synchronous>, transform_indices = @transform_4, window_bounds = array<i64: 1, 128>}, {transform_indices = @transform_5, window_bounds = array<i64: 16, 128>}]} {
    %c0 = arith.constant 0 : index
    %c0_0 = arith.constant 0 : index
    %0 = vector.load %arg2[%c0, %c0_0] : memref<16x128xbf16, #tpu.memory_space<vmem>>, vector<16x128xbf16>
    %c0_1 = arith.constant 0 : index
    %c0_2 = arith.constant 0 : index
    %1 = vector.load %arg3[%c0_1, %c0_2] : memref<128x128xbf16, #tpu.memory_space<vmem>>, vector<128x128xbf16>
    %cst = arith.constant dense<0.000000e+00> : vector<16x128xf32>
    %2 = tpu.matmul %0, %1, %cst {dimension_numbers = #tpu.dot_dimension_numbers<[1], [0], [0], [1], [0, 0, 1, 1], [], []>} : vector<16x128xbf16>, vector<128x128xbf16>, vector<16x128xf32> -> vector<16x128xf32>
    %c0_3 = arith.constant 0 : index
    %c0_4 = arith.constant 0 : index
    %3 = vector.load %arg4[%c0_3, %c0_4] : memref<1x128xf32, #tpu.memory_space<vmem>>, vector<1x128xf32>
    %4 = vector.broadcast %3 : vector<1x128xf32> to vector<16x128xf32>
    %5 = arith.addf %2, %4 : vector<16x128xf32>
    %cst_5 = arith.constant 5.000000e-01 : f32
    %6 = vector.broadcast %cst_5 : f32 to vector<16x128xf32>
    %7 = arith.mulf %6, %5 : vector<16x128xf32>
    %cst_6 = arith.constant 0.707106769 : f32
    %8 = vector.broadcast %cst_6 : f32 to vector<16x128xf32>
    %9 = arith.mulf %5, %8 : vector<16x128xf32>
    %10 = math.erf %9 : vector<16x128xf32>
    %cst_7 = arith.constant 1.000000e+00 : f32
    %11 = vector.broadcast %cst_7 : f32 to vector<16x128xf32>
    %12 = arith.addf %11, %10 : vector<16x128xf32>
    %13 = arith.mulf %7, %12 : vector<16x128xf32>
    %14 = arith.truncf %13 : vector<16x128xf32> to vector<16x128xbf16>
    %c0_8 = arith.constant 0 : index
    %c0_9 = arith.constant 0 : index
    %15 = vector.load %arg5[%c0_8, %c0_9] : memref<128x128xbf16, #tpu.memory_space<vmem>>, vector<128x128xbf16>
    %cst_10 = arith.constant dense<0.000000e+00> : vector<16x128xf32>
    %16 = tpu.matmul %14, %15, %cst_10 {dimension_numbers = #tpu.dot_dimension_numbers<[1], [0], [0], [1], [0, 0, 1, 1], [], []>} : vector<16x128xbf16>, vector<128x128xbf16>, vector<16x128xf32> -> vector<16x128xf32>
    %c0_i32 = arith.constant 0 : i32
    %17 = arith.cmpi eq, %arg1, %c0_i32 : i32
    %18 = arith.extui %17 : i1 to i32
    %c0_i32_11 = arith.constant 0 : i32
    %19 = arith.cmpi ne, %18, %c0_i32_11 : i32
    scf.if %19 {
      %c0_16 = arith.constant 0 : index
      %c0_17 = arith.constant 0 : index
      %26 = vector.load %arg8[%c0_16, %c0_17] : memref<16x128xf32, #tpu.memory_space<vmem>>, vector<16x128xf32>
      tpu.vector_store %arg8[%c0_16, %c0_17], %16 {strides = array<i32>} : memref<16x128xf32, #tpu.memory_space<vmem>>, vector<16x128xf32>,
    } else {
    }
    %c0_i32_12 = arith.constant 0 : i32
    %20 = arith.cmpi sgt, %arg1, %c0_i32_12 : i32
    %21 = arith.extui %20 : i1 to i32
    %c0_i32_13 = arith.constant 0 : i32
    %22 = arith.cmpi ne, %21, %c0_i32_13 : i32
    scf.if %22 {
      %c0_16 = arith.constant 0 : index
      %c0_17 = arith.constant 0 : index
      %26 = vector.load %arg8[%c0_16, %c0_17] : memref<16x128xf32, #tpu.memory_space<vmem>>, vector<16x128xf32>
      %27 = arith.addf %26, %16 : vector<16x128xf32>
      %c0_18 = arith.constant 0 : index
      %c0_19 = arith.constant 0 : index
      %28 = vector.load %arg8[%c0_18, %c0_19] : memref<16x128xf32, #tpu.memory_space<vmem>>, vector<16x128xf32>
      tpu.vector_store %arg8[%c0_18, %c0_19], %27 {strides = array<i32>} : memref<16x128xf32, #tpu.memory_space<vmem>>, vector<16x128xf32>,
    } else {
    }
    %c0_i32_14 = arith.constant 0 : i32
    %23 = arith.cmpi eq, %arg1, %c0_i32_14 : i32
    %24 = arith.extui %23 : i1 to i32
    %c0_i32_15 = arith.constant 0 : i32
    %25 = arith.cmpi ne, %24, %c0_i32_15 : i32
    scf.if %25 {
      %c0_16 = arith.constant 0 : index
      %c0_17 = arith.constant 0 : index
      %26 = vector.load %arg8[%c0_16, %c0_17] : memref<16x128xf32, #tpu.memory_space<vmem>>, vector<16x128xf32>
      %c0_18 = arith.constant 0 : index
      %c0_19 = arith.constant 0 : index
      %27 = vector.load %arg6[%c0_18, %c0_19] : memref<1x128xf32, #tpu.memory_space<vmem>>, vector<1x128xf32>
      %28 = vector.broadcast %27 : vector<1x128xf32> to vector<16x128xf32>
      %29 = arith.addf %26, %28 : vector<16x128xf32>
      %30 = arith.truncf %29 : vector<16x128xf32> to vector<16x128xbf16>
      %c0_20 = arith.constant 0 : index
      %c0_21 = arith.constant 0 : index
      %31 = vector.load %arg7[%c0_20, %c0_21] : memref<16x128xbf16, #tpu.memory_space<vmem>>, vector<16x128xbf16>
      tpu.vector_store %arg7[%c0_20, %c0_21], %30 {strides = array<i32>} : memref<16x128xbf16, #tpu.memory_space<vmem>>, vector<16x128xbf16>,
    } else {
    }
    return
  }
  func.func @transform_0(%arg0: i32, %arg1: i32) -> (i32, i32) {
    %c0_i32 = arith.constant 0 : i32
    %c0_i32_0 = arith.constant 0 : i32
    return %arg0, %c0_i32 : i32, i32
  }
  func.func @transform_1(%arg0: i32, %arg1: i32) -> (i32, i32) {
    %c0_i32 = arith.constant 0 : i32
    %c0_i32_0 = arith.constant 0 : i32
    return %c0_i32, %arg1 : i32, i32
  }
  func.func @transform_2(%arg0: i32, %arg1: i32) -> (i32, i32) {
    %c0_i32 = arith.constant 0 : i32
    %c0_i32_0 = arith.constant 0 : i32
    return %c0_i32, %arg1 : i32, i32
  }
  func.func @transform_3(%arg0: i32, %arg1: i32) -> (i32, i32) {
    %c0_i32 = arith.constant 0 : i32
    %c0_i32_0 = arith.constant 0 : i32
    return %arg1, %c0_i32 : i32, i32
  }
  func.func @transform_4(%arg0: i32, %arg1: i32) -> (i32, i32) {
    %c0_i32 = arith.constant 0 : i32
    %c0_i32_0 = arith.constant 0 : i32
    %c0_i32_1 = arith.constant 0 : i32
    return %c0_i32, %c0_i32_0 : i32, i32
  }
  func.func @transform_5(%arg0: i32, %arg1: i32) -> (i32, i32) {
    %c0_i32 = arith.constant 0 : i32
    %c0_i32_0 = arith.constant 0 : i32
    return %arg0, %c0_i32 : i32, i32
  }
}

</mosaic_0001>

<bundles_post_ra>
// kernel: tpu_custom_call.1
= control target key start
LH: loop header
LB: loop body
LE: loop exit
PB: predicated region body
PF: predicated region fallthrough
CT: control target
= control target key end

     0   :  { %10 = vsyncpa [#allocation4], 0  ;;  %s626_s0 = inlined_call_operand.hbm [shape: bf16[16,128], index: 0, kind: input, shape index: {}]   ;;  %s627_s1 = inlined_call_operand.hbm [shape: bf16[128,128], index: 1, kind: input, shape index: {}]   ;;  %s628_s2 = inlined_call_operand.vmem [shape: f32[1,128], index: 2, kind: input, shape index: {}]   ;;  %s629_s3 = inlined_call_operand.hbm [shape: bf16[128,128], index: 3, kind: input, shape index: {}]   ;;  %s630_s4 = inlined_call_operand.vmem [shape: f32[1,128], index: 4, kind: input, shape index: {}]   ;;  %s631_s5 = inlined_call_operand.hbm [shape: bf16[16,128], index: 5, kind: output, shape index: {}]  }
   0x1   :  { %11 = vsyncpa [#allocation7], 0 }
   0x2   :  { %12 = vsyncpa [#allocation5], 0  ;;  %s558_s18 = smov [#allocation6]   ;;  %s559_s20 = smov [#allocation3]  }
   0x3   :  { %s30_s19 = sshll.u32 %s558_s18, 4  ;;  %s18_s21 = sshll.u32 %s559_s20, 4  ;;  %s31_s19 = int_to_ptr.vmem [resolvable:$true] %s30_s19  ;;  %s19_s21 = int_to_ptr.vmem [resolvable:$true] %s18_s21 }
   0x4   :  { %s480_s22 = scalar_lea.vmem %s31_s19, 1024  ;;  %p485_p1 = scmp.lt.s32.totalorder %s31_s19, %s31_s19 }
   0x5   :  { %p481_p0 = scmp.ne.s32.totalorder %s31_s19, %s480_s22  ;;  %p486_p2 = scmp.lt.s32.totalorder %s480_s22, %s480_s22 }
   0x7   :  { %p487_p3 = por %p486_p2, %p485_p1 }
   0x9   :  { %p488_p4 = pnand %p487_p3, %p481_p0 }
   0xb   :  { %491 = shalt.err (!%p488_p4)
}
   0xc   :  { %s560_s23 = smov 64   ;;  %s561_s24 = smov 4  }
   0xd   :  { %36 = dma.hbm_to_vmem [thread:$0]  %s627_s1, 1024, %s31_s19, [#allocation7], %s560_s23, %s560_s23, %s561_s24  }
   0xe   :  { %s500_s27 = scalar_lea.vmem %s19_s21, 128  ;;  %p505_p6 = scmp.lt.s32.totalorder %s19_s21, %s19_s21 }
   0xf   :  { %p501_p5 = scmp.ne.s32.totalorder %s19_s21, %s500_s27  ;;  %p506_p7 = scmp.lt.s32.totalorder %s500_s27, %s500_s27 }
  0x11   :  { %p507_p8 = por %p506_p7, %p505_p6 }
  0x13   :  { %p508_p9 = pnand %p507_p8, %p501_p5 }
  0x15   :  { %511 = shalt.err (!%p508_p9)
}
  0x16   :  { %24 = dma.hbm_to_vmem [thread:$0]  %s626_s0, 128, %s19_s21, [#allocation4], %s560_s23, %s560_s23, %s561_s24  }
  0x17   :  { %s562_s30 = smov [#allocation8]  }
  0x18   :  { %s44_s6 = sshll.u32 %s562_s30, 4  ;;  %s45_s6 = int_to_ptr.vmem [resolvable:$true] %s44_s6 }
  0x19   :  { %s520_s7 = scalar_lea.vmem %s45_s6, 1024  ;;  %p525_p11 = scmp.lt.s32.totalorder %s45_s6, %s45_s6 }
  0x1a   :  { %p521_p10 = scmp.ne.s32.totalorder %s45_s6, %s520_s7  ;;  %p526_p12 = scmp.lt.s32.totalorder %s520_s7, %s520_s7 }
  0x1c   :  { %p527_p13 = por %p526_p12, %p525_p11 }
  0x1e   :  { %p528_p0 = pnand %p527_p13, %p521_p10 }
  0x20   :  { %531 = shalt.err (!%p528_p0)
}
  0x21   :  { %50 = dma.hbm_to_vmem [thread:$0]  %s629_s3, 1024, %s45_s6, [#allocation7], %s560_s23, %s560_s23, %s561_s24  }
  0x22   :  { %552 = dma.done.wait [#allocation4], 128  }
  0x23   :  { %553 = vsyncadd [#allocation4], 4294967168 }
  0x24   :  { %554 = dma.done.wait [#allocation7], 2048  }
  0x25   :  { %555 = vsyncadd [#allocation7], 4294965248  ;;  %v563_v0 = vmov 0.0   ;;  %vm564_vm0 = vmmov 0   ;;  %v451_v1 = vld [vmem:[#allocation6 + $0x38] sm:$0xff]   ;;  %v452_v2 = vld [vmem:[#allocation6 + $0x30] sm:$0xff]  }
  0x26   :  { %403 = vmatprep.subr.bf16.mxu0 %v563_v0  ;;  %419 = vmatprep.mubr.msk.bf16.mxu0 %vm564_vm0, %v563_v0  ;;  %v453_v3 = vld [vmem:[#allocation6 + $0x28] sm:$0xff]   ;;  %v460_v4 = vld [vmem:[#allocation8 + $0x38] sm:$0xff]   ;;  %v454_v5 = vld [vmem:[#allocation6 + $0x20] sm:$0xff]   ;;  %s565_s10 = smov [#allocation9]  }
  0x27   :  { %423 = vmatprep.subr.bf16.mxu1 %v563_v0  ;;  %439 = vmatprep.mubr.msk.bf16.mxu1 %vm564_vm0, %v563_v0  ;;  %v455_v6 = vld [vmem:[#allocation6 + $0x18] sm:$0xff]   ;;  %v456_v7 = vld [vmem:[#allocation6 + $0x10] sm:$0xff]   ;;  %v457_v8 = vld [vmem:[#allocation6 + $0x8] sm:$0xff]   ;;  %s344_s11 = sshll.u32 %s565_s10, 4  ;;  %s345_s11 = int_to_ptr.vmem [resolvable:$true] %s344_s11 }
  0x28   :  { %404 = vmatpush3.bf16.msra.mxu0 %v451_v1  ;;  %424 = vmatpush3.bf16.msra.mxu1 %v460_v4  ;;  %v458_v9 = vld [vmem:[#allocation6] sm:$0xff]   ;;  %v459_v10 = vld [vmem:[#allocation3] sm:$0xff]   ;;  %v461_v11 = vld [vmem:[#allocation8 + $0x30] sm:$0xff]   ;;  %s532_s12 = scalar_lea.vmem %s345_s11, 128  ;;  %p537_p2 = scmp.lt.s32.totalorder %s345_s11, %s345_s11 }
  0x29   :  { %405 = vmatprep.subr.bf16.mxu0 %v563_v0  ;;  %425 = vmatprep.subr.bf16.mxu1 %v563_v0  ;;  %v462_v12 = vld [vmem:[#allocation8 + $0x28] sm:$0xff]   ;;  %v463_v13 = vld [vmem:[#allocation8 + $0x20] sm:$0xff]   ;;  %v464_v14 = vld [vmem:[#allocation8 + $0x18] sm:$0xff]   ;;  %p533_p1 = scmp.ne.s32.totalorder %s345_s11, %s532_s12  ;;  %p538_p3 = scmp.lt.s32.totalorder %s532_s12, %s532_s12 }
  0x2a   :  { %v465_v15 = vld [vmem:[#allocation8 + $0x10] sm:$0xff]   ;;  %v466_v16 = vld [vmem:[#allocation8 + $0x8] sm:$0xff]   ;;  %v467_v17 = vld [vmem:[#allocation8] sm:$0xff]  }
  0x2b   :  { %v357_v18 = vld [vmem:[%s628_s2] ss:$0 sm:$0xff]  ;;  %p539_p4 = por %p538_p3, %p537_p2 }
  0x2c   :  { %406 = vmatpush3.bf16.msra.mxu0 %v452_v2  ;;  %426 = vmatpush3.bf16.msra.mxu1 %v461_v11  ;;  %v375_v37 = vld [vmem:[%s630_s4] ss:$0 sm:$0xff] }
  0x2d   :  { %407 = vmatprep.subr.bf16.mxu0 %v563_v0  ;;  %427 = vmatprep.subr.bf16.mxu1 %v563_v0  ;;  %p540_p5 = pnand %p539_p4, %p533_p1 }
  0x30   :  { %408 = vmatpush3.bf16.msra.mxu0 %v453_v3  ;;  %428 = vmatpush3.bf16.msra.mxu1 %v462_v12 }
  0x31   :  { %409 = vmatprep.subr.bf16.mxu0 %v563_v0  ;;  %429 = vmatprep.subr.bf16.mxu1 %v563_v0 }
  0x34   :  { %410 = vmatpush3.bf16.msra.mxu0 %v454_v5  ;;  %430 = vmatpush3.bf16.msra.mxu1 %v463_v13 }
  0x35   :  { %411 = vmatprep.subr.bf16.mxu0 %v563_v0  ;;  %431 = vmatprep.subr.bf16.mxu1 %v563_v0 }
  0x38   :  { %412 = vmatpush3.bf16.msra.mxu0 %v455_v6  ;;  %432 = vmatpush3.bf16.msra.mxu1 %v464_v14 }
  0x39   :  { %413 = vmatprep.subr.bf16.mxu0 %v563_v0  ;;  %433 = vmatprep.subr.bf16.mxu1 %v563_v0 }
  0x3c   :  { %414 = vmatpush3.bf16.msra.mxu0 %v456_v7  ;;  %434 = vmatpush3.bf16.msra.mxu1 %v465_v15 }
  0x3d   :  { %415 = vmatprep.subr.bf16.mxu0 %v563_v0  ;;  %435 = vmatprep.subr.bf16.mxu1 %v563_v0 }
  0x40   :  { %416 = vmatpush3.bf16.msra.mxu0 %v457_v8  ;;  %436 = vmatpush3.bf16.msra.mxu1 %v466_v16 }
  0x41   :  { %417 = vmatprep.subr.bf16.mxu0 %v563_v0  ;;  %437 = vmatprep.subr.bf16.mxu1 %v563_v0 }
  0x44   :  { %418 = vmatpush3.bf16.msra.mxu0 %v458_v9  ;;  %438 = vmatpush3.bf16.msra.mxu1 %v467_v17 }
  0x47   :  { %420 = vmatmul.mubr.bf16.vlgmr.msra.gmra.mxu0 %v459_v10 }
 0x107   :  { %v176_v19 = vpop.f32.mrf.mxu0 }
 0x108   :  { %v177_v20 = vadd.f32 %v357_v18, %v176_v19 }
 0x109   :  { %v421_v21 = vpop.f32.mrf.mxu0 }
 0x10a   :  { %v185_v22 = vmul.f32 0.70710677, %v177_v20  ;;  %v183_v30 = vmul.f32 0.5, %v177_v20 }
 0x10b   :  { %v179_v23 = vpop.f32.mrf.mxu0 }
 0x10c   :  { %468 = verf.f32 %v185_v22  ;;  %v180_v24 = vadd.f32 %v357_v18, %v179_v23 }
 0x10d   :  { %v422_v25 = vpop.f32.mrf.mxu0 }
 0x10e   :  { %v186_v26 = vmul.f32 0.70710677, %v180_v24  ;;  %v184_v31 = vmul.f32 0.5, %v180_v24 }
 0x110   :  { %470 = verf.f32 %v186_v26 }
 0x119   :  { %v469_v27 = vpop.eup %468 }
 0x11a   :  { %v189_v28 = vadd.f32 1.0, %v469_v27 }
 0x11c   :  { %v191_v33 = vmul.f32 %v189_v28, %v183_v30 }
 0x11d   :  { %v471_v29 = vpop.eup %470 }
 0x11e   :  { %v190_v32 = vadd.f32 1.0, %v471_v29 }
 0x120   :  { %v192_v34 = vmul.f32 %v190_v32, %v184_v31 }
 0x122   :  { %v193_v35 = vpack.c.bf16 %v192_v34, %v191_v33 }
 0x124   :  { %440 = vmatmul.mubr.bf16.vlgmr.msra.gmra.mxu1 %v193_v35 }
 0x1e4   :  { %v292_v36 = vpop.f32.mrf.mxu1 }
 0x1e5   :  { %v327_v40 = vadd.f32 %v375_v37, %v292_v36 }
 0x1e6   :  { %v441_v38 = vpop.f32.mrf.mxu1 }
 0x1e8   :  { %v295_v39 = vpop.f32.mrf.mxu1 }
 0x1e9   :  { %v328_v41 = vadd.f32 %v375_v37, %v295_v39 }
 0x1ea   :  { %v442_v42 = vpop.f32.mrf.mxu1 }
 0x1eb   :  { %v383_v43 = vpack.c.bf16 %v328_v41, %v327_v40 }
 0x1ed   :  { %384 = vst [vmem:[#allocation9] sm:$0xff] %v383_v43  }
 0x1ee   :  { %543 = shalt.err (!%p540_p5)
}
 0x1ef   :  { %350 = dma.vmem_to_hbm [thread:$0]  %s345_s11, 128, %s631_s5, [#allocation5], %s560_s23, %s560_s23, %s561_s24  }
 0x1f0   :  { %556 = dma.done.wait [#allocation5], 128  }
 0x1f1   :  { %557 = vsyncadd [#allocation5], 4294967168 }
 0x1f2   :  { %354 = vsyncpa [#allocation4], 1 }
 0x1f3   :  { %355 = vsyncpa [#allocation7], 1 }
 0x1f4   :  { %356 = vsyncpa [#allocation5], 1 }

</bundles_post_ra>
